<compile_context>
chip_gen: v5e
topology: v5e:2x2
jax: 0.10.0
libtpu: 0.0.40
codegen_flags: <defaults>
</compile_context>

<pallas_src>
import functools

import jax
import jax.numpy as jnp
from jax.experimental import pallas as pl
from jax.experimental.pallas import tpu as pltpu

IN_DIM = 64
HIDDEN = (IN_DIM, IN_DIM * 2, IN_DIM)   # (64, 128, 64)
LN_EPS = 1e-5
LRELU_SLOPE = 0.2


def _leaky_relu(x, slope):
    return jnp.where(x > 0, x, slope * x)


def bary_kernel(z_ref, ws_ref, w1_ref, bs_ref, b1_ref, o_ref):
    """One batch tile: (tb, 64) -> (tb, 64).

    z_ref : (tb, 64)   input tile (compute dtype)
    ws_ref: (256, 64)  stacked [w0; w2; w3]      (compute dtype)
    w1_ref: (64, 128)  block-1 weight            (compute dtype)
    bs_ref: (5, 64)    stacked [b0; gamma; beta; b2; b3]  (f32)
    b1_ref: (1, 128)   block-1 bias              (f32)
    """
    cdt = ws_ref.dtype

    w0 = ws_ref[0:64, :]
    w2 = ws_ref[64:192, :]
    w3 = ws_ref[192:256, :]

    bs = bs_ref[...]
    b0, gamma, beta, b2, b3 = bs[0:1], bs[1:2], bs[2:3], bs[3:4], bs[4:5]

    # initial_linear: 64 -> 64 (MXU, f32 accumulation)
    x = jnp.dot(z_ref[...], w0, preferred_element_type=jnp.float32) + b0

    # LayerNorm over last dim (biased variance, eps=1e-5) + affine; f32 elementwise
    mu = jnp.mean(x, axis=-1, keepdims=True)
    var = jnp.mean((x - mu) * (x - mu), axis=-1, keepdims=True)
    x = (x - mu) * jax.lax.rsqrt(var + LN_EPS)
    x = x * gamma + beta

    # ReLU
    x = jnp.maximum(x, 0.0)

    # LayerNormBlock 1: Linear 64 -> 128, LeakyReLU(0.2)
    x = jnp.dot(x.astype(cdt), w1_ref[...], preferred_element_type=jnp.float32) + b1_ref[...]
    x = _leaky_relu(x, LRELU_SLOPE)

    # LayerNormBlock 2: Linear 128 -> 64, LeakyReLU(0.2)
    x = jnp.dot(x.astype(cdt), w2, preferred_element_type=jnp.float32) + b2
    x = _leaky_relu(x, LRELU_SLOPE)

    # final_linear: 64 -> 64
    x = jnp.dot(x.astype(cdt), w3, preferred_element_type=jnp.float32) + b3

    # Note: output last dim is 64 (<128) -> masked stores; lane-dense folding would require
    # an in-kernel (tb,64)->(tb/2,128) reshape that materializes a VMEM copy, so we skip it.
    o_ref[...] = x.astype(o_ref.dtype)


def _round_up(x, m):
    return (x + m - 1) // m * m


def _full_spec(shape):
    # full-extent block, replicated across the batch grid
    return pl.BlockSpec(shape, lambda i: (0,) * len(shape))


@functools.partial(jax.jit, static_argnames=("tb", "compute_dtype"))
def bary_transform(z, params, *, tb=1024, compute_dtype=jnp.bfloat16):
    B, D = z.shape
    assert D == IN_DIM
    (w0, b0, g, beta, w1, b1, w2, b2, w3, b3) = params

    # Pack the 10 small parameter tensors into 4 operands.
    ws = jnp.concatenate([w0, w2, w3], axis=0).astype(compute_dtype)   # (256, 64)
    w1c = w1.astype(compute_dtype)                                     # (64, 128)
    bs = jnp.concatenate([b0, g, beta, b2, b3], axis=0)                # (5, 64) f32
    # b1 stays (1, 128) f32

    # Large batch tiles (multiple of 8) amortize per-step overhead and fill MXU rows.
    # Pad the batch so every tile is full (remainder handling).
    tb_eff = min(tb, _round_up(B, 8))
    Bp = _round_up(B, tb_eff)
    zp = jnp.pad(z, ((0, Bp - B), (0, 0))) if Bp != B else z
    zp = zp.astype(compute_dtype)

    grid = (Bp // tb_eff,)
    in_specs = [
        pl.BlockSpec((tb_eff, IN_DIM), lambda i: (i, 0)),   # z tile
        _full_spec(ws.shape),
        _full_spec(w1c.shape),
        _full_spec(bs.shape),
        _full_spec(b1.shape),
    ]
    out_spec = pl.BlockSpec((tb_eff, IN_DIM), lambda i: (i, 0))

    flops = 2 * Bp * (64 * 64 + 64 * 128 + 128 * 64 + 64 * 64)
    bytes_accessed = (
        Bp * IN_DIM * (jnp.dtype(compute_dtype).itemsize + 4)          # z in + f32 out
        + ws.size * ws.dtype.itemsize + w1c.size * w1c.dtype.itemsize
        + bs.size * 4 + b1.size * 4
    )

    out = pl.pallas_call(
        bary_kernel,
        out_shape=jax.ShapeDtypeStruct((Bp, IN_DIM), jnp.float32),
        grid_spec=pltpu.PrefetchScalarGridSpec(
            num_scalar_prefetch=0,
            grid=grid,
            in_specs=in_specs,
            out_specs=out_spec,
        ),
        compiler_params=pltpu.CompilerParams(
            dimension_semantics=("parallel",)),   # batch tiles shard across TCs on v7x
        cost_estimate=pl.CostEstimate(
            flops=flops, transcendentals=Bp, bytes_accessed=bytes_accessed),
    )(zp, ws, w1c, bs, b1)

    return out[:B]


def init_params(key):
    """Deterministic parameter init mimicking nn.Linear / nn.LayerNorm shapes.

    Linear weights are stored pre-transposed: (in_features, out_features).
    Biases / LN affine params are stored as (1, features) for 2-D tiles.
    """
    ks = jax.random.split(key, 8)

    def lin(kw, kb, fan_in, fan_out):
        bound = 1.0 / (fan_in ** 0.5)
        w = jax.random.uniform(kw, (fan_in, fan_out), jnp.float32, -bound, bound)
        b = jax.random.uniform(kb, (1, fan_out), jnp.float32, -bound, bound)
        return w, b

    w0, b0 = lin(ks[0], ks[1], IN_DIM, HIDDEN[0])          # initial_linear 64->64
    g = jnp.ones((1, HIDDEN[0]), jnp.float32)              # LayerNorm gamma
    beta = jnp.zeros((1, HIDDEN[0]), jnp.float32)          # LayerNorm beta
    w1, b1 = lin(ks[2], ks[3], HIDDEN[0], HIDDEN[1])       # block1 64->128
    w2, b2 = lin(ks[4], ks[5], HIDDEN[1], HIDDEN[2])       # block2 128->64
    w3, b3 = lin(ks[6], ks[7], HIDDEN[2], IN_DIM)          # final_linear 64->64
    return (w0, b0, g, beta, w1, b1, w2, b2, w3, b3)


def reference_forward(z, params, compute_dtype=jnp.float32):
    """Pure-JAX reference applying the same compute-dtype casts on MXU operands."""
    (w0, b0, g, beta, w1, b1, w2, b2, w3, b3) = params
    cd = compute_dtype

    def mm(x, w):
        return jnp.dot(x.astype(cd), w.astype(cd), preferred_element_type=jnp.float32)

    x = mm(z, w0) + b0
    mu = x.mean(-1, keepdims=True)
    var = ((x - mu) ** 2).mean(-1, keepdims=True)
    x = (x - mu) * jax.lax.rsqrt(var + LN_EPS) * g + beta
    x = jnp.maximum(x, 0.0)
    x = mm(x, w1) + b1
    x = jnp.where(x > 0, x, LRELU_SLOPE * x)
    x = mm(x, w2) + b2
    x = jnp.where(x > 0, x, LRELU_SLOPE * x)
    x = mm(x, w3) + b3
    return x


if __name__ == "__main__":
    key = jax.random.PRNGKey(0)
    kz, kp = jax.random.split(key)
    params = init_params(kp)

    # f32 path
    B = 16
    z = jax.random.normal(kz, (B, IN_DIM), jnp.float32)
    out = jax.block_until_ready(bary_transform(z, params, compute_dtype=jnp.float32))
    ref = reference_forward(z, params, compute_dtype=jnp.float32)
    assert out.shape == (B, IN_DIM)
    assert jnp.allclose(out, ref, atol=1e-4, rtol=1e-4), "f32 mismatch vs reference"

    # bf16 MXU path (f32 accumulation, f32 elementwise), matched reference
    out_bf = jax.block_until_ready(bary_transform(z, params, compute_dtype=jnp.bfloat16))
    ref_bf = reference_forward(z, params, compute_dtype=jnp.bfloat16)
    assert jnp.allclose(out_bf, ref_bf, atol=5e-3, rtol=5e-3), "bf16 mismatch vs reference"

    # ragged batch (exercises batch padding / remainder tile handling)
    B2 = 19
    z2 = jax.random.normal(kz, (B2, IN_DIM), jnp.float32)
    out2 = jax.block_until_ready(bary_transform(z2, params, compute_dtype=jnp.float32))
    ref2 = reference_forward(z2, params, compute_dtype=jnp.float32)
    assert out2.shape == (B2, IN_DIM)
    assert jnp.allclose(out2, ref2, atol=1e-4, rtol=1e-4), "ragged-batch mismatch vs reference"

    print("KERNEL_OK")
</pallas_src>

<mosaic_0001>
module attributes {stable_mosaic.version = 11 : i64} {
  func.func @bary_kernel(%arg0: i32, %arg1: memref<16x64xf32, #tpu.memory_space<vmem>>, %arg2: memref<256x64xf32, #tpu.memory_space<vmem>>, %arg3: memref<64x128xf32, #tpu.memory_space<vmem>>, %arg4: memref<5x64xf32, #tpu.memory_space<vmem>>, %arg5: memref<1x128xf32, #tpu.memory_space<vmem>>, %arg6: memref<16x64xf32, #tpu.memory_space<vmem>>) attributes {dimension_semantics = [#tpu.dimension_semantics<parallel>], iteration_bounds = array<i64: 1>, scalar_prefetch = 0 : i64, scratch_operands = 0 : i64, tpu.core_type = #tpu.core_type<tc>, window_params = [{transform_indices = @transform_0, window_bounds = array<i64: 16, 64>}, {pipeline_mode = #tpu.pipeline_mode<synchronous>, transform_indices = @transform_1, window_bounds = array<i64: 256, 64>}, {pipeline_mode = #tpu.pipeline_mode<synchronous>, transform_indices = @transform_2, window_bounds = array<i64: 64, 128>}, {pipeline_mode = #tpu.pipeline_mode<synchronous>, transform_indices = @transform_3, window_bounds = array<i64: 5, 64>}, {pipeline_mode = #tpu.pipeline_mode<synchronous>, transform_indices = @transform_4, window_bounds = array<i64: 1, 128>}, {transform_indices = @transform_5, window_bounds = array<i64: 16, 64>}]} {
    %c0 = arith.constant 0 : index
    %c0_0 = arith.constant 0 : index
    %0 = vector.load %arg2[%c0, %c0_0] : memref<256x64xf32, #tpu.memory_space<vmem>>, vector<64x64xf32>
    %c64 = arith.constant 64 : index
    %c0_1 = arith.constant 0 : index
    %1 = vector.load %arg2[%c64, %c0_1] : memref<256x64xf32, #tpu.memory_space<vmem>>, vector<128x64xf32>
    %c192 = arith.constant 192 : index
    %c0_2 = arith.constant 0 : index
    %2 = vector.load %arg2[%c192, %c0_2] : memref<256x64xf32, #tpu.memory_space<vmem>>, vector<64x64xf32>
    %c0_3 = arith.constant 0 : index
    %c0_4 = arith.constant 0 : index
    %3 = vector.load %arg4[%c0_3, %c0_4] : memref<5x64xf32, #tpu.memory_space<vmem>>, vector<5x64xf32>
    %4 = vector.extract_strided_slice %3 {offsets = [0, 0], sizes = [1, 64], strides = [1, 1]} : vector<5x64xf32> to vector<1x64xf32>
    %5 = vector.extract_strided_slice %3 {offsets = [1, 0], sizes = [1, 64], strides = [1, 1]} : vector<5x64xf32> to vector<1x64xf32>
    %6 = vector.extract_strided_slice %3 {offsets = [2, 0], sizes = [1, 64], strides = [1, 1]} : vector<5x64xf32> to vector<1x64xf32>
    %7 = vector.extract_strided_slice %3 {offsets = [3, 0], sizes = [1, 64], strides = [1, 1]} : vector<5x64xf32> to vector<1x64xf32>
    %8 = vector.extract_strided_slice %3 {offsets = [4, 0], sizes = [1, 64], strides = [1, 1]} : vector<5x64xf32> to vector<1x64xf32>
    %c0_5 = arith.constant 0 : index
    %c0_6 = arith.constant 0 : index
    %9 = vector.load %arg1[%c0_5, %c0_6] : memref<16x64xf32, #tpu.memory_space<vmem>>, vector<16x64xf32>
    %cst = arith.constant dense<0.000000e+00> : vector<16x64xf32>
    %10 = tpu.matmul %9, %0, %cst {dimension_numbers = #tpu.dot_dimension_numbers<[1], [0], [0], [1], [0, 0, 1, 1], [], []>} : vector<16x64xf32>, vector<64x64xf32>, vector<16x64xf32> -> vector<16x64xf32>
    %11 = vector.broadcast %4 : vector<1x64xf32> to vector<16x64xf32>
    %12 = arith.addf %10, %11 : vector<16x64xf32>
    %cst_7 = arith.constant dense<0.000000e+00> : vector<16xf32>
    %13 = vector.multi_reduction <add>, %12, %cst_7 [1] : vector<16x64xf32> to vector<16xf32>
    %14 = vector.shape_cast %13 : vector<16xf32> to vector<16x1xf32>
    %cst_8 = arith.constant 6.400000e+01 : f32
    %15 = vector.broadcast %cst_8 : f32 to vector<16x1xf32>
    %16 = arith.divf %14, %15 : vector<16x1xf32>
    %17 = vector.broadcast %16 : vector<16x1xf32> to vector<16x64xf32>
    %18 = arith.subf %12, %17 : vector<16x64xf32>
    %19 = vector.broadcast %16 : vector<16x1xf32> to vector<16x64xf32>
    %20 = arith.subf %12, %19 : vector<16x64xf32>
    %21 = arith.mulf %18, %20 : vector<16x64xf32>
    %cst_9 = arith.constant dense<0.000000e+00> : vector<16xf32>
    %22 = vector.multi_reduction <add>, %21, %cst_9 [1] : vector<16x64xf32> to vector<16xf32>
    %23 = vector.shape_cast %22 : vector<16xf32> to vector<16x1xf32>
    %cst_10 = arith.constant 6.400000e+01 : f32
    %24 = vector.broadcast %cst_10 : f32 to vector<16x1xf32>
    %25 = arith.divf %23, %24 : vector<16x1xf32>
    %26 = vector.broadcast %16 : vector<16x1xf32> to vector<16x64xf32>
    %27 = arith.subf %12, %26 : vector<16x64xf32>
    %cst_11 = arith.constant 9.99999974E-6 : f32
    %28 = vector.broadcast %cst_11 : f32 to vector<16x1xf32>
    %29 = arith.addf %25, %28 : vector<16x1xf32>
    %30 = math.rsqrt %29 : vector<16x1xf32>
    %31 = vector.broadcast %30 : vector<16x1xf32> to vector<16x64xf32>
    %32 = arith.mulf %27, %31 : vector<16x64xf32>
    %33 = vector.broadcast %5 : vector<1x64xf32> to vector<16x64xf32>
    %34 = arith.mulf %32, %33 : vector<16x64xf32>
    %35 = vector.broadcast %6 : vector<1x64xf32> to vector<16x64xf32>
    %36 = arith.addf %34, %35 : vector<16x64xf32>
    %cst_12 = arith.constant 0.000000e+00 : f32
    %37 = vector.broadcast %cst_12 : f32 to vector<16x64xf32>
    %38 = arith.maximumf %36, %37 : vector<16x64xf32>
    %c0_13 = arith.constant 0 : index
    %c0_14 = arith.constant 0 : index
    %39 = vector.load %arg3[%c0_13, %c0_14] : memref<64x128xf32, #tpu.memory_space<vmem>>, vector<64x128xf32>
    %cst_15 = arith.constant dense<0.000000e+00> : vector<16x128xf32>
    %40 = tpu.matmul %38, %39, %cst_15 {dimension_numbers = #tpu.dot_dimension_numbers<[1], [0], [0], [1], [0, 0, 1, 1], [], []>} : vector<16x64xf32>, vector<64x128xf32>, vector<16x128xf32> -> vector<16x128xf32>
    %c0_16 = arith.constant 0 : index
    %c0_17 = arith.constant 0 : index
    %41 = vector.load %arg5[%c0_16, %c0_17] : memref<1x128xf32, #tpu.memory_space<vmem>>, vector<1x128xf32>
    %42 = vector.broadcast %41 : vector<1x128xf32> to vector<16x128xf32>
    %43 = arith.addf %40, %42 : vector<16x128xf32>
    %cst_18 = arith.constant 0.000000e+00 : f32
    %44 = vector.broadcast %cst_18 : f32 to vector<16x128xf32>
    %45 = arith.cmpf ogt, %43, %44 : vector<16x128xf32>
    %cst_19 = arith.constant 2.000000e-01 : f32
    %46 = vector.broadcast %cst_19 : f32 to vector<16x128xf32>
    %47 = arith.mulf %46, %43 : vector<16x128xf32>
    %48 = arith.select %45, %43, %47 : vector<16x128xi1>, vector<16x128xf32>
    %cst_20 = arith.constant dense<0.000000e+00> : vector<16x64xf32>
    %49 = tpu.matmul %48, %1, %cst_20 {dimension_numbers = #tpu.dot_dimension_numbers<[1], [0], [0], [1], [0, 0, 1, 1], [], []>} : vector<16x128xf32>, vector<128x64xf32>, vector<16x64xf32> -> vector<16x64xf32>
    %50 = vector.broadcast %7 : vector<1x64xf32> to vector<16x64xf32>
    %51 = arith.addf %49, %50 : vector<16x64xf32>
    %cst_21 = arith.constant 0.000000e+00 : f32
    %52 = vector.broadcast %cst_21 : f32 to vector<16x64xf32>
    %53 = arith.cmpf ogt, %51, %52 : vector<16x64xf32>
    %cst_22 = arith.constant 2.000000e-01 : f32
    %54 = vector.broadcast %cst_22 : f32 to vector<16x64xf32>
    %55 = arith.mulf %54, %51 : vector<16x64xf32>
    %56 = arith.select %53, %51, %55 : vector<16x64xi1>, vector<16x64xf32>
    %cst_23 = arith.constant dense<0.000000e+00> : vector<16x64xf32>
    %57 = tpu.matmul %56, %2, %cst_23 {dimension_numbers = #tpu.dot_dimension_numbers<[1], [0], [0], [1], [0, 0, 1, 1], [], []>} : vector<16x64xf32>, vector<64x64xf32>, vector<16x64xf32> -> vector<16x64xf32>
    %58 = vector.broadcast %8 : vector<1x64xf32> to vector<16x64xf32>
    %59 = arith.addf %57, %58 : vector<16x64xf32>
    %c0_24 = arith.constant 0 : index
    %c0_25 = arith.constant 0 : index
    %60 = vector.load %arg6[%c0_24, %c0_25] : memref<16x64xf32, #tpu.memory_space<vmem>>, vector<16x64xf32>
    tpu.vector_store %arg6[%c0_24, %c0_25], %59 {strides = array<i32>} : memref<16x64xf32, #tpu.memory_space<vmem>>, vector<16x64xf32>,
    return
  }
  func.func @transform_0(%arg0: i32) -> (i32, i32) {
    %c0_i32 = arith.constant 0 : i32
    %c0_i32_0 = arith.constant 0 : i32
    return %arg0, %c0_i32 : i32, i32
  }
  func.func @transform_1(%arg0: i32) -> (i32, i32) {
    %c0_i32 = arith.constant 0 : i32
    %c0_i32_0 = arith.constant 0 : i32
    %c0_i32_1 = arith.constant 0 : i32
    return %c0_i32, %c0_i32_0 : i32, i32
  }
  func.func @transform_2(%arg0: i32) -> (i32, i32) {
    %c0_i32 = arith.constant 0 : i32
    %c0_i32_0 = arith.constant 0 : i32
    %c0_i32_1 = arith.constant 0 : i32
    return %c0_i32, %c0_i32_0 : i32, i32
  }
  func.func @transform_3(%arg0: i32) -> (i32, i32) {
    %c0_i32 = arith.constant 0 : i32
    %c0_i32_0 = arith.constant 0 : i32
    %c0_i32_1 = arith.constant 0 : i32
    return %c0_i32, %c0_i32_0 : i32, i32
  }
  func.func @transform_4(%arg0: i32) -> (i32, i32) {
    %c0_i32 = arith.constant 0 : i32
    %c0_i32_0 = arith.constant 0 : i32
    %c0_i32_1 = arith.constant 0 : i32
    return %c0_i32, %c0_i32_0 : i32, i32
  }
  func.func @transform_5(%arg0: i32) -> (i32, i32) {
    %c0_i32 = arith.constant 0 : i32
    %c0_i32_0 = arith.constant 0 : i32
    return %arg0, %c0_i32 : i32, i32
  }
}

</mosaic_0001>

<bundles_post_ra>
// kernel: bary_transform.1
= control target key start
LH: loop header
LB: loop body
LE: loop exit
PB: predicated region body
PF: predicated region fallthrough
CT: control target
= control target key end

     0   :  { %s514_s0 = inlined_call_operand.vmem [shape: f32[16,64], index: 0, kind: input, shape index: {}]   ;;  %s515_s1 = inlined_call_operand.vmem [shape: f32[256,64], index: 1, kind: input, shape index: {}]   ;;  %s516_s2 = inlined_call_operand.vmem [shape: f32[64,128], index: 2, kind: input, shape index: {}]   ;;  %s517_s3 = inlined_call_operand.vmem [shape: f32[5,64], index: 3, kind: input, shape index: {}]   ;;  %s518_s4 = inlined_call_operand.vmem [shape: f32[1,128], index: 4, kind: input, shape index: {}]   ;;  %s519_s5 = inlined_call_operand.hbm [shape: f32[16,64], index: 5, kind: output, shape index: {}]  }
   0x1   :  { %v28_v0 = vld [vmem:[%s515_s1 + $0x38] sm:$0xff]  ;;  %v27_v1 = vld [vmem:[%s515_s1 + $0x30] sm:$0xff]  ;;  %v26_v2 = vld [vmem:[%s515_s1 + $0x28] sm:$0xff] }
   0x2   :  { %72 = vmatpush.msra.mxu0 %v28_v0  ;;  %v25_v3 = vld [vmem:[%s515_s1 + $0x20] sm:$0xff] }
   0x4   :  { %73 = vmatpush.msra.mxu0 %v27_v1 }
   0x5   :  { %10 = vsyncpa [#allocation3], 0  ;;  %v24_v4 = vld [vmem:[%s515_s1 + $0x18] sm:$0xff]  ;;  %v23_v5 = vld [vmem:[%s515_s1 + $0x10] sm:$0xff]  ;;  %vm57_vm0 = vcmask 523264   ;;  %v316_v18 = vmov 64.0  }
   0x6   :  { %74 = vmatpush.msra.mxu0 %v26_v2  ;;  %v22_v6 = vld [vmem:[%s515_s1 + $0x8] sm:$0xff]  ;;  %v21_v7 = vld [vmem:[%s515_s1] sm:$0xff]  ;;  %284 = vrcp.f32 %v316_v18  ;;  %v153_v35 = vld [vmem:[%s516_s2 + $0x38] sm:$0xff]  ;;  %s261_s25 = sshll.u32 %s519_s5, 4  ;;  %s318_s26 = smov 128   ;;  %s262_s25 = int_to_ptr.hbm [resolvable:$true] %s261_s25 }
   0x7   :  { %v54_v8 = vld [vmem:[%s514_s0] sm:$0xff]  ;;  %v55_v9 = vld [vmem:[%s514_s0 + $0x8] sm:$0xff]  ;;  %172 = vmatpush.msra.mxu1 %v153_v35  ;;  %v152_v36 = vld [vmem:[%s516_s2 + $0x30] sm:$0xff]  ;;  %s319_s27 = smov 8  }
   0x8   :  { %75 = vmatpush.msra.mxu0 %v25_v3  ;;  %v385_v10 = vld [vmem:[%s517_s3] sm:$0x1f]  ;;  %v151_v37 = vld [vmem:[%s516_s2 + $0x28] sm:$0xff]  ;;  %v149_v39 = vld [vmem:[%s516_s2 + $0x18] sm:$0xff] }
   0x9   :  { %v56_v11 = vperm.slane %v385_v10, 0  ;;  %173 = vmatpush.msra.mxu1 %v152_v36  ;;  %v150_v38 = vld [vmem:[%s516_s2 + $0x20] sm:$0xff]  ;;  %v148_v40 = vld [vmem:[%s516_s2 + $0x10] sm:$0xff]  ;;  %v147_v41 = vld [vmem:[%s516_s2 + $0x8] sm:$0xff]  ;;  %v138_v1 = vperm.slane %v385_v10, 1 }
   0xa   :  { %76 = vmatpush.msra.mxu0 %v24_v4  ;;  %v146_v42 = vld [vmem:[%s516_s2] sm:$0xff]  ;;  %v44_v46 = vld [vmem:[%s515_s1 + $0xb8] sm:$0xff]  ;;  %v43_v47 = vld [vmem:[%s515_s1 + $0xb0] sm:$0xff] }
   0xb   :  { %174 = vmatpush.msra.mxu1 %v151_v37  ;;  %194 = vmatpush.msra.mxu2 %v44_v46  ;;  %v42_v50 = vld [vmem:[%s515_s1 + $0xa8] sm:$0xff]  ;;  %v41_v53 = vld [vmem:[%s515_s1 + $0xa0] sm:$0xff]  ;;  %v40_v55 = vld [vmem:[%s515_s1 + $0x98] sm:$0xff] }
   0xc   :  { %77 = vmatpush.msra.mxu0 %v23_v5  ;;  %v285_v19 = vpop.eup %284  ;;  %v39_v57 = vld [vmem:[%s515_s1 + $0x90] sm:$0xff]  ;;  %v38_v59 = vld [vmem:[%s515_s1 + $0x88] sm:$0xff]  ;;  %v37_v62 = vld [vmem:[%s515_s1 + $0x80] sm:$0xff] }
   0xd   :  { %v94_v20 = vmul.f32 64.0, %v285_v19  ;;  %vm98_vm1 = vweird.f32 %v285_v19  ;;  %175 = vmatpush.msra.mxu1 %v150_v38  ;;  %195 = vmatpush.msra.mxu2 %v43_v47  ;;  %v36_v2 = vld [vmem:[%s515_s1 + $0x78] sm:$0xff] }
   0xe   :  { %78 = vmatpush.msra.mxu0 %v22_v6  ;;  %v141_v6 = vperm.slane %v385_v10, 2 }
   0xf   :  { %v95_v21 = vsub.f32 1.0, %v94_v20  ;;  %176 = vmatpush.msra.mxu1 %v149_v39  ;;  %196 = vmatpush.msra.mxu2 %v42_v50 }
  0x10   :  { %79 = vmatpush.msra.mxu0 %v21_v7  ;;  %v35_v7 = vld [vmem:[%s515_s1 + $0x70] sm:$0xff] }
  0x11   :  { %273 = vmatmul.msk.f32.vlgmr.msra.gmra.mxu0 %vm57_vm0, %v54_v8  ;;  %v96_v22 = vmul.f32 %v285_v19, %v95_v21  ;;  %177 = vmatpush.msra.mxu1 %v148_v40  ;;  %v47_v40 = vld [vmem:[%s515_s1 + $0xd0] sm:$0xff] }
  0x12   :  { %197 = vmatpush.msra.mxu2 %v41_v53 }
  0x13   :  { %v97_v23 = vadd.f32 %v285_v19, %v96_v22  ;;  %178 = vmatpush.msra.mxu1 %v147_v41  ;;  %v46_v41 = vld [vmem:[%s515_s1 + $0xc8] sm:$0xff] }
  0x14   :  { %198 = vmatpush.msra.mxu2 %v40_v55 }
  0x15   :  { %v99_v24 = vsel %vm98_vm1, %v285_v19, %v97_v23  ;;  %179 = vmatpush.msra.mxu1 %v146_v42  ;;  %v31_v23 = vld [vmem:[%s515_s1 + $0x50] sm:$0xff]  ;;  %v45_v42 = vld [vmem:[%s515_s1 + $0xc0] sm:$0xff] }
  0x16   :  { %199 = vmatpush.msra.mxu2 %v39_v57 }
  0x18   :  { %200 = vmatpush.msra.mxu2 %v38_v59 }
  0x19   :  { %274 = vmatmul.msk.f32.gmra.mxu0 %vm57_vm0, %v55_v9 }
  0x1a   :  { %201 = vmatpush.msra.mxu2 %v37_v62 }
  0x1c   :  { %202 = vmatpush.msra.mxu2 %v36_v2 }
  0x1e   :  { %203 = vmatpush.msra.mxu2 %v35_v7 }
  0x8e   :  { %v81_v12 = vpop.f32.mrf.mxu0 }
  0x8f   :  { %v82_v13 = vadd.f32 %v81_v12, %v56_v11 }
  0x91   :  { %v87_v14 = vsel %vm57_vm0, %v82_v13, 0.0 }
  0x92   :  { %88 = vadd.xlane.f32.xlu0 %v87_v14  ;;  %v33_v14 = vld [vmem:[%s515_s1 + $0x60] sm:$0xff] }
  0x96   :  { %v84_v15 = vpop.f32.mrf.mxu0 }
  0x97   :  { %v85_v16 = vadd.f32 %v84_v15, %v56_v11  ;;  %v34_v11 = vld [vmem:[%s515_s1 + $0x68] sm:$0xff] }
  0x98   :  { %204 = vmatpush.msra.mxu2 %v34_v11 }
  0x99   :  { %v90_v17 = vsel %vm57_vm0, %v85_v16, 0.0 }
  0x9a   :  { %91 = vadd.xlane.f32.xlu0 %v90_v17  ;;  %v32_v17 = vld [vmem:[%s515_s1 + $0x58] sm:$0xff]  ;;  %205 = vmatpush.msra.mxu2 %v33_v14 }
  0x9c   :  { %206 = vmatpush.msra.mxu2 %v32_v17 }
  0x9e   :  { %207 = vmatpush.msra.mxu2 %v31_v23 }
 0x105   :  { %v89_v25 = vpop.xlane.xlu0 %88 }
 0x106   :  { %v100_v26 = vmul.f32 %v99_v24, %v89_v25  ;;  %v29_v25 = vld [vmem:[%s515_s1 + $0x40] sm:$0xff] }
 0x108   :  { %v390_v27 = vsub.f32 %v82_v13, %v100_v26  ;;  %v52_v26 = vld [vmem:[%s515_s1 + $0xf8] sm:$0xff] }
 0x109   :  { %238 = vmatpush.msra.mxu3 %v52_v26 }
 0x10a   :  { %v104_v28 = vmul.f32 %v390_v27, %v390_v27 }
 0x10c   :  { %v106_v29 = vsel %vm57_vm0, %v104_v28, 0.0  ;;  %v50_v28 = vld [vmem:[%s515_s1 + $0xe8] sm:$0xff] }
 0x10d   :  { %107 = vadd.xlane.f32.xlu1 %v106_v29  ;;  %v92_v30 = vpop.xlane.xlu0 %91  ;;  %v49_v29 = vld [vmem:[%s515_s1 + $0xe0] sm:$0xff] }
 0x10e   :  { %v101_v31 = vmul.f32 %v99_v24, %v92_v30  ;;  %v48_v30 = vld [vmem:[%s515_s1 + $0xd8] sm:$0xff] }
 0x110   :  { %v395_v32 = vsub.f32 %v85_v16, %v101_v31  ;;  %v283_v31 = vld [vmem:[%s518_s4] ss:$0 sm:$0xff] }
 0x112   :  { %v105_v33 = vmul.f32 %v395_v32, %v395_v32 }
 0x114   :  { %v109_v34 = vsel %vm57_vm0, %v105_v33, 0.0 }
 0x115   :  { %110 = vadd.xlane.f32.xlu1 %v109_v34 }
 0x180   :  { %v108_v43 = vpop.xlane.xlu1 %107 }
 0x181   :  { %v112_v44 = vmul.f32 %v108_v43, %v99_v24  ;;  %v193_v43 = vperm.slane %v385_v10, 3 }
 0x183   :  { %v114_v45 = vadd.f32 1e-05, %v112_v44 }
 0x185   :  { %286 = vrsqrt.f32 %v114_v45  ;;  %vm122_vm3 = vweird.f32 %v114_v45 }
 0x188   :  { %v111_v48 = vpop.xlane.xlu1 %110 }
 0x189   :  { %v113_v49 = vmul.f32 %v111_v48, %v99_v24  ;;  %v30_v24 = vld [vmem:[%s515_s1 + $0x48] sm:$0xff] }
 0x18a   :  { %208 = vmatpush.msra.mxu2 %v30_v24 }
 0x18b   :  { %v287_v51 = vpop.eup %286  ;;  %v115_v52 = vadd.f32 1e-05, %v113_v49 }
 0x18c   :  { %v117_v54 = vmul.f32 %v287_v51, %v114_v45  ;;  %vm123_vm2 = vweird.f32 %v287_v51  ;;  %209 = vmatpush.msra.mxu2 %v29_v25 }
 0x18d   :  { %288 = vrsqrt.f32 %v115_v52  ;;  %vm124_vm4 = vmor %vm122_vm3, %vm123_vm2  ;;  %vm132_vm6 = vweird.f32 %v115_v52 }
 0x18e   :  { %v118_v56 = vmul.f32 %v287_v51, %v117_v54 }
 0x190   :  { %v119_v58 = vmul.f32 0.5, %v118_v56 }
 0x192   :  { %v120_v60 = vsub.f32 1.5, %v119_v58 }
 0x193   :  { %v289_v61 = vpop.eup %288 }
 0x194   :  { %v121_v63 = vmul.f32 %v287_v51, %v120_v60  ;;  %v127_v0 = vmul.f32 %v289_v61, %v115_v52  ;;  %vm133_vm5 = vweird.f32 %v289_v61  ;;  %v223_v52 = vperm.slane %v385_v10, 4 }
 0x195   :  { %vm134_vm7 = vmor %vm132_vm6, %vm133_vm5 }
 0x196   :  { %v125_v3 = vsel %vm124_vm4, %v287_v51, %v121_v63  ;;  %v128_v4 = vmul.f32 %v289_v61, %v127_v0 }
 0x197   :  { %v136_v5 = vmul.f32 %v125_v3, %v390_v27  ;;  %v51_v27 = vld [vmem:[%s515_s1 + $0xf0] sm:$0xff]  ;;  %s317_s1 = smov [#allocation2]  }
 0x198   :  { %v129_v8 = vmul.f32 0.5, %v128_v4  ;;  %239 = vmatpush.msra.mxu3 %v51_v27  ;;  %s259_s22 = sshll.u32 %s317_s1, 4  ;;  %s260_s22 = int_to_ptr.vmem [resolvable:$true] %s259_s22 }
 0x199   :  { %v139_v9 = vmul.f32 %v138_v1, %v136_v5 }
 0x19a   :  { %v130_v12 = vsub.f32 1.5, %v129_v8  ;;  %240 = vmatpush.msra.mxu3 %v50_v28 }
 0x19b   :  { %v142_v13 = vadd.f32 %v141_v6, %v139_v9 }
 0x19c   :  { %v131_v15 = vmul.f32 %v289_v61, %v130_v12  ;;  %241 = vmatpush.msra.mxu3 %v49_v29 }
 0x19d   :  { %v144_v16 = vmax.f32 %v142_v13, 0.0 }
 0x19e   :  { %v135_v18 = vsel %vm134_vm7, %v289_v61, %v131_v15  ;;  %242 = vmatpush.msra.mxu3 %v48_v30 }
 0x19f   :  { %275 = vmatmul.msk.f32.vlgmr.msra.gmra.mxu1 %vm57_vm0, %v144_v16  ;;  %v137_v19 = vmul.f32 %v135_v18, %v395_v32 }
 0x1a0   :  { %243 = vmatpush.msra.mxu3 %v47_v40 }
 0x1a1   :  { %v140_v20 = vmul.f32 %v138_v1, %v137_v19 }
 0x1a2   :  { %244 = vmatpush.msra.mxu3 %v46_v41 }
 0x1a3   :  { %v143_v21 = vadd.f32 %v141_v6, %v140_v20 }
 0x1a4   :  { %245 = vmatpush.msra.mxu3 %v45_v42 }
 0x1a5   :  { %v145_v22 = vmax.f32 %v143_v21, 0.0 }
 0x1a7   :  { %276 = vmatmul.msk.f32.gmra.mxu1 %vm57_vm0, %v145_v22 }
 0x21c   :  { %v181_v32 = vpop.f32.mrf.mxu1 }
 0x21d   :  { %v182_v33 = vadd.f32 %v283_v31, %v181_v32 }
 0x21f   :  { %vm187_vm8 = vcmp.gt.f32.partialorder %v182_v33, 0.0  ;;  %v189_v34 = vmul.f32 0.2, %v182_v33 }
 0x221   :  { %v191_v35 = vsel %vm187_vm8, %v182_v33, %v189_v34 }
 0x222   :  { %210 = vmatmul.f32.vlgmr.msra.gmra.mxu2 %v191_v35 }
 0x224   :  { %v184_v36 = vpop.f32.mrf.mxu1 }
 0x225   :  { %v185_v37 = vadd.f32 %v283_v31, %v184_v36 }
 0x227   :  { %vm188_vm9 = vcmp.gt.f32.partialorder %v185_v37, 0.0  ;;  %v190_v38 = vmul.f32 0.2, %v185_v37 }
 0x229   :  { %v192_v39 = vsel %vm188_vm9, %v185_v37, %v190_v38 }
 0x22a   :  { %213 = vmatmul.f32.gmra.mxu2 %v192_v39 }
 0x2a5   :  { %v211_v44 = vpop.f32.mrf.mxu2 }
 0x2a6   :  { %v212_v45 = vadd.f32 %v211_v44, %v193_v43 }
 0x2a8   :  { %v219_v46 = vmul.f32 0.2, %v212_v45  ;;  %vm217_vm10 = vcmp.gt.f32.partialorder %v212_v45, 0.0 }
 0x2aa   :  { %v221_v47 = vsel %vm217_vm10, %v212_v45, %v219_v46 }
 0x2ab   :  { %277 = vmatmul.msk.f32.vlgmr.msra.gmra.mxu3 %vm57_vm0, %v221_v47 }
 0x2ad   :  { %v214_v48 = vpop.f32.mrf.mxu2 }
 0x2ae   :  { %v215_v49 = vadd.f32 %v214_v48, %v193_v43 }
 0x2b0   :  { %v220_v50 = vmul.f32 0.2, %v215_v49  ;;  %vm218_vm11 = vcmp.gt.f32.partialorder %v215_v49, 0.0 }
 0x2b2   :  { %v222_v51 = vsel %vm218_vm11, %v215_v49, %v220_v50 }
 0x2b3   :  { %278 = vmatmul.msk.f32.gmra.mxu3 %vm57_vm0, %v222_v51 }
 0x32e   :  { %v247_v53 = vpop.f32.mrf.mxu3 }
 0x32f   :  { %v248_v54 = vadd.f32 %v247_v53, %v223_v52 }
 0x331   :  { %253 = vst.msk [vmem:[#allocation2] sm:$0xff] %vm57_vm0, %v248_v54 }
 0x336   :  { %v250_v55 = vpop.f32.mrf.mxu3 }
 0x337   :  { %v251_v56 = vadd.f32 %v250_v55, %v223_v52 }
 0x339   :  { %254 = vst.msk [vmem:[#allocation2 + $0x8] sm:$0xff] %vm57_vm0, %v251_v56 }
 0x33a   :  { %267 = dma.vmem_to_hbm [thread:$0]  %s260_s22, 256, %s262_s25, [#allocation3], %s318_s26, %s318_s26, %s319_s27  }
 0x33b   :  { %314 = dma.done.wait [#allocation3], 256  }
 0x33c   :  { %315 = vsyncadd [#allocation3], 4294967040 }
 0x33d   :  { %272 = vsyncpa [#allocation3], 1 }

</bundles_post_ra>
